<compile_context>
chip_gen: v5e
topology: v5e:2x2
jax: 0.10.0
libtpu: 0.0.40
codegen_flags: <defaults>
</compile_context>

<pallas_src>
import functools

import jax
import jax.numpy as jnp
from jax.experimental import pallas as pl
from jax.experimental.pallas import tpu as pltpu


def policy_forward_kernel(state_ref, w1_ref, w2_ref, wh_ref, bias_ref, out_ref):
    """Fused MLP forward for one batch tile.

    state_ref : [TILE_B, obs]      (pipelined over the batch grid axis)
    w1_ref    : [obs, H]           (VMEM-resident across grid steps)
    w2_ref    : [H, H]
    wh_ref    : [H, HEAD_PAD]      (action + value heads packed, zero-padded)
    bias_ref  : [3, HEAD_PAD]      rows: b1, b2, packed head bias
    out_ref   : [TILE_B, HEAD_PAD] lane-dense fused output
    """
    x = state_ref[...]                                               # [TB, obs]

    h = jnp.dot(x, w1_ref[...], preferred_element_type=jnp.float32)
    h = jnp.maximum(h + bias_ref[0:1, :], 0.0)                       # [TB, H]

    h = jnp.dot(h, w2_ref[...], preferred_element_type=jnp.float32)
    h = jnp.maximum(h + bias_ref[1:2, :], 0.0)                       # [TB, H]

    out_ref[...] = (
        jnp.dot(h, wh_ref[...], preferred_element_type=jnp.float32)
        + bias_ref[2:3, :]
    )                                                                # [TB, PAD]


def pack_params(params, head_pad=128):
    """Pack the 8 per-layer tensors into 4 kernel operands."""
    w1 = params["w1"]                        # [obs, H]
    w2 = params["w2"]                        # [H, H]
    H = w1.shape[1]
    A = params["wa"].shape[1]
    assert H == head_pad, "packing assumes hidden width == 128-lane pad"

    wh = jnp.zeros((H, head_pad), jnp.float32)
    wh = wh.at[:, :A].set(params["wa"]).at[:, A:A + 1].set(params["wv"])

    bh = jnp.zeros((1, head_pad), jnp.float32)
    bh = bh.at[:, :A].set(params["ba"]).at[:, A:A + 1].set(params["bv"])

    biases = jnp.concatenate([params["b1"], params["b2"], bh], axis=0)  # [3,128]
    return w1, w2, wh, biases, A


@functools.partial(jax.jit, static_argnames=("tile_b",))
def policy_forward(state, params, *, tile_b=128):
    """state: [B, obs_dim] f32 -> (action_logits [B, A], state_value [B, 1])."""
    B, obs_dim = state.shape
    w1, w2, wh, biases, A = pack_params(params)
    H = w1.shape[1]
    head_pad = wh.shape[1]

    # Pad a ragged batch up to a multiple of the batch tile.
    n_tiles = pl.cdiv(B, tile_b)
    Bp = n_tiles * tile_b
    if Bp != B:
        state = jnp.pad(state, ((0, Bp - B), (0, 0)))

    out = pl.pallas_call(
        policy_forward_kernel,
        out_shape=jax.ShapeDtypeStruct((Bp, head_pad), jnp.float32),
        grid=(n_tiles,),
        in_specs=[
            # state tile streams with the grid; last dim == full array dim (obs).
            pl.BlockSpec((tile_b, obs_dim), lambda i: (i, 0)),
            # weights / biases: same block every step -> stay VMEM-resident.
            pl.BlockSpec((obs_dim, H), lambda i: (0, 0)),
            pl.BlockSpec((H, H), lambda i: (0, 0)),
            pl.BlockSpec((H, head_pad), lambda i: (0, 0)),
            pl.BlockSpec((3, head_pad), lambda i: (0, 0)),
        ],
        out_specs=pl.BlockSpec((tile_b, head_pad), lambda i: (i, 0)),
        compiler_params=pltpu.CompilerParams(
            dimension_semantics=("parallel",),  # megacore sharding on v7x
        ),
    )(state, w1, w2, wh, biases)

    logits = out[:B, :A]
    value = out[:B, A:A + 1]
    return logits, value


def init_params(key, obs_dim=8, hidden=128, action_dim=4):
    """PyTorch nn.Linear default init: U(-1/sqrt(fan_in), 1/sqrt(fan_in))."""
    def linear(k, fan_in, fan_out):
        kw, kb = jax.random.split(k)
        bound = 1.0 / jnp.sqrt(jnp.float32(fan_in))
        w = jax.random.uniform(kw, (fan_in, fan_out), jnp.float32, -bound, bound)
        b = jax.random.uniform(kb, (1, fan_out), jnp.float32, -bound, bound)
        return w, b

    k1, k2, k3, k4 = jax.random.split(key, 4)
    w1, b1 = linear(k1, obs_dim, hidden)
    w2, b2 = linear(k2, hidden, hidden)
    wa, ba = linear(k3, hidden, action_dim)
    wv, bv = linear(k4, hidden, 1)
    return dict(w1=w1, b1=b1, w2=w2, b2=b2, wa=wa, ba=ba, wv=wv, bv=bv)


def reference_forward(state, p):
    """Pure-JAX reference of the PyTorch forward (correctness check)."""
    h = jnp.maximum(state @ p["w1"] + p["b1"], 0.0)
    h = jnp.maximum(h @ p["w2"] + p["b2"], 0.0)
    return h @ p["wa"] + p["ba"], h @ p["wv"] + p["bv"]


if __name__ == "__main__":
    key = jax.random.PRNGKey(0)
    k_params, k_state = jax.random.split(key)

    OBS_DIM, HIDDEN, ACTION_DIM = 8, 128, 4     # LunarLander-v2 dims
    BATCH, TILE_B = 256, 128                    # batched rollout states

    params = init_params(k_params, OBS_DIM, HIDDEN, ACTION_DIM)
    state = jax.random.normal(k_state, (BATCH, OBS_DIM), jnp.float32)

    logits, value = policy_forward(state, params, tile_b=TILE_B)
    logits = jax.block_until_ready(logits)
    value = jax.block_until_ready(value)

    ref_logits, ref_value = reference_forward(state, params)
    assert logits.shape == (BATCH, ACTION_DIM)
    assert value.shape == (BATCH, 1)
    assert jnp.allclose(logits, ref_logits, atol=1e-5, rtol=1e-5)
    assert jnp.allclose(value, ref_value, atol=1e-5, rtol=1e-5)

    # Also exercise a ragged (non-multiple-of-tile) batch path.
    small = state[:40]
    lg2, vl2 = policy_forward(small, params, tile_b=TILE_B)
    jax.block_until_ready(lg2)
    assert jnp.allclose(lg2, ref_logits[:40], atol=1e-5, rtol=1e-5)
    assert jnp.allclose(vl2, ref_value[:40], atol=1e-5, rtol=1e-5)

    # TODO(synk): select_action's Categorical sampling and calculate_loss /
    # GAE (Python-loop recurrences over episode memory) are host-side training
    # logic, not part of the nn.Module forward hot path, so they are not
    # implemented as Pallas kernels.

    print("KERNEL_OK")
</pallas_src>

<mosaic_0001>
module attributes {stable_mosaic.version = 11 : i64} {
  func.func @policy_forward_kernel(%arg0: i32, %arg1: memref<128x8xf32, #tpu.memory_space<vmem>>, %arg2: memref<8x128xf32, #tpu.memory_space<vmem>>, %arg3: memref<128x128xf32, #tpu.memory_space<vmem>>, %arg4: memref<128x128xf32, #tpu.memory_space<vmem>>, %arg5: memref<3x128xf32, #tpu.memory_space<vmem>>, %arg6: memref<128x128xf32, #tpu.memory_space<vmem>>) attributes {dimension_semantics = [#tpu.dimension_semantics<parallel>], iteration_bounds = array<i64: 2>, scalar_prefetch = 0 : i64, scratch_operands = 0 : i64, tpu.core_type = #tpu.core_type<tc>, window_params = [{transform_indices = @transform_0, window_bounds = array<i64: 128, 8>}, {pipeline_mode = #tpu.pipeline_mode<synchronous>, transform_indices = @transform_1, window_bounds = array<i64: 8, 128>}, {pipeline_mode = #tpu.pipeline_mode<synchronous>, transform_indices = @transform_2, window_bounds = array<i64: 128, 128>}, {pipeline_mode = #tpu.pipeline_mode<synchronous>, transform_indices = @transform_3, window_bounds = array<i64: 128, 128>}, {pipeline_mode = #tpu.pipeline_mode<synchronous>, transform_indices = @transform_4, window_bounds = array<i64: 3, 128>}, {transform_indices = @transform_5, window_bounds = array<i64: 128, 128>}]} {
    %c0 = arith.constant 0 : index
    %c0_0 = arith.constant 0 : index
    %0 = vector.load %arg1[%c0, %c0_0] : memref<128x8xf32, #tpu.memory_space<vmem>>, vector<128x8xf32>
    %c0_1 = arith.constant 0 : index
    %c0_2 = arith.constant 0 : index
    %1 = vector.load %arg2[%c0_1, %c0_2] : memref<8x128xf32, #tpu.memory_space<vmem>>, vector<8x128xf32>
    %cst = arith.constant dense<0.000000e+00> : vector<128x128xf32>
    %2 = tpu.matmul %0, %1, %cst {dimension_numbers = #tpu.dot_dimension_numbers<[1], [0], [0], [1], [0, 0, 1, 1], [], []>} : vector<128x8xf32>, vector<8x128xf32>, vector<128x128xf32> -> vector<128x128xf32>
    %c0_3 = arith.constant 0 : index
    %c0_4 = arith.constant 0 : index
    %3 = vector.load %arg5[%c0_3, %c0_4] : memref<3x128xf32, #tpu.memory_space<vmem>>, vector<1x128xf32>
    %4 = vector.broadcast %3 : vector<1x128xf32> to vector<128x128xf32>
    %5 = arith.addf %2, %4 : vector<128x128xf32>
    %cst_5 = arith.constant 0.000000e+00 : f32
    %6 = vector.broadcast %cst_5 : f32 to vector<128x128xf32>
    %7 = arith.maximumf %5, %6 : vector<128x128xf32>
    %c0_6 = arith.constant 0 : index
    %c0_7 = arith.constant 0 : index
    %8 = vector.load %arg3[%c0_6, %c0_7] : memref<128x128xf32, #tpu.memory_space<vmem>>, vector<128x128xf32>
    %cst_8 = arith.constant dense<0.000000e+00> : vector<128x128xf32>
    %9 = tpu.matmul %7, %8, %cst_8 {dimension_numbers = #tpu.dot_dimension_numbers<[1], [0], [0], [1], [0, 0, 1, 1], [], []>} : vector<128x128xf32>, vector<128x128xf32>, vector<128x128xf32> -> vector<128x128xf32>
    %c1 = arith.constant 1 : index
    %c0_9 = arith.constant 0 : index
    %10 = vector.load %arg5[%c1, %c0_9] : memref<3x128xf32, #tpu.memory_space<vmem>>, vector<1x128xf32>
    %11 = vector.broadcast %10 : vector<1x128xf32> to vector<128x128xf32>
    %12 = arith.addf %9, %11 : vector<128x128xf32>
    %cst_10 = arith.constant 0.000000e+00 : f32
    %13 = vector.broadcast %cst_10 : f32 to vector<128x128xf32>
    %14 = arith.maximumf %12, %13 : vector<128x128xf32>
    %c0_11 = arith.constant 0 : index
    %c0_12 = arith.constant 0 : index
    %15 = vector.load %arg4[%c0_11, %c0_12] : memref<128x128xf32, #tpu.memory_space<vmem>>, vector<128x128xf32>
    %cst_13 = arith.constant dense<0.000000e+00> : vector<128x128xf32>
    %16 = tpu.matmul %14, %15, %cst_13 {dimension_numbers = #tpu.dot_dimension_numbers<[1], [0], [0], [1], [0, 0, 1, 1], [], []>} : vector<128x128xf32>, vector<128x128xf32>, vector<128x128xf32> -> vector<128x128xf32>
    %c2 = arith.constant 2 : index
    %c0_14 = arith.constant 0 : index
    %17 = vector.load %arg5[%c2, %c0_14] : memref<3x128xf32, #tpu.memory_space<vmem>>, vector<1x128xf32>
    %18 = vector.broadcast %17 : vector<1x128xf32> to vector<128x128xf32>
    %19 = arith.addf %16, %18 : vector<128x128xf32>
    %c0_15 = arith.constant 0 : index
    %c0_16 = arith.constant 0 : index
    %20 = vector.load %arg6[%c0_15, %c0_16] : memref<128x128xf32, #tpu.memory_space<vmem>>, vector<128x128xf32>
    tpu.vector_store %arg6[%c0_15, %c0_16], %19 {strides = array<i32>} : memref<128x128xf32, #tpu.memory_space<vmem>>, vector<128x128xf32>,
    return
  }
  func.func @transform_0(%arg0: i32) -> (i32, i32) {
    %c0_i32 = arith.constant 0 : i32
    %c0_i32_0 = arith.constant 0 : i32
    return %arg0, %c0_i32 : i32, i32
  }
  func.func @transform_1(%arg0: i32) -> (i32, i32) {
    %c0_i32 = arith.constant 0 : i32
    %c0_i32_0 = arith.constant 0 : i32
    %c0_i32_1 = arith.constant 0 : i32
    return %c0_i32, %c0_i32_0 : i32, i32
  }
  func.func @transform_2(%arg0: i32) -> (i32, i32) {
    %c0_i32 = arith.constant 0 : i32
    %c0_i32_0 = arith.constant 0 : i32
    %c0_i32_1 = arith.constant 0 : i32
    return %c0_i32, %c0_i32_0 : i32, i32
  }
  func.func @transform_3(%arg0: i32) -> (i32, i32) {
    %c0_i32 = arith.constant 0 : i32
    %c0_i32_0 = arith.constant 0 : i32
    %c0_i32_1 = arith.constant 0 : i32
    return %c0_i32, %c0_i32_0 : i32, i32
  }
  func.func @transform_4(%arg0: i32) -> (i32, i32) {
    %c0_i32 = arith.constant 0 : i32
    %c0_i32_0 = arith.constant 0 : i32
    %c0_i32_1 = arith.constant 0 : i32
    return %c0_i32, %c0_i32_0 : i32, i32
  }
  func.func @transform_5(%arg0: i32) -> (i32, i32) {
    %c0_i32 = arith.constant 0 : i32
    %c0_i32_0 = arith.constant 0 : i32
    return %arg0, %c0_i32 : i32, i32
  }
}

</mosaic_0001>

<bundles_post_ra>
// kernel: policy_forward.1
= control target key start
LH: loop header
LB: loop body
LE: loop exit
PB: predicated region body
PF: predicated region fallthrough
CT: control target
= control target key end

     0   :  { %s739_s18 = smov 0   ;;  %s941_s0 = inlined_call_operand.vmem [shape: f32[256,8], index: 0, kind: input, shape index: {}]   ;;  %s942_s1 = inlined_call_operand.vmem [shape: f32[8,128], index: 1, kind: input, shape index: {}]   ;;  %s943_s2 = inlined_call_operand.vmem [shape: f32[128,128], index: 2, kind: input, shape index: {}]   ;;  %s944_s3 = inlined_call_operand.vmem [shape: f32[128,128], index: 3, kind: input, shape index: {}]   ;;  %s945_s4 = inlined_call_operand.vmem [shape: f32[3,128], index: 4, kind: input, shape index: {}]   ;;  %s946_s5 = inlined_call_operand.vmem [shape: f32[256,128], index: 5, kind: output, shape index: {}]  }
   0x1 LB: > { %s631_s19 = sadd.s32 4294967295, %s707_s18   ;;  %p635_p0 = scmp.ge.s32.totalorder %s707_s18, 1  ;;  %s707_s18 = sphi %s739_s18, %s15_s18  }
   0x2   : > { %p188_p1 = scmp.lt.s32.totalorder %s707_s18, 3 }
   0x4   : > { %p189_p2 = pnand %p635_p0, %p188_p1 }
   0x5   : > { %s636_s22 = sshll.u32 (!%p189_p2), %s631_s19, 4 }
   0x6   : > { %192 = sbr.rel (%p189_p2) target bundleno = 536 (0x218), region = 40  ;;  %p217_p3 = scmp.lt.s32.totalorder (!%p189_p2), %s636_s22, 31 }
   0xb   : > { %v244_v0 = vld [vmem:[%s942_s1] sm:$0xff]  ;;  %s948_s22 = smov (!%p217_p3, %s636_s22), 31  ;;  %vm247_vm0 = vcmask 64512   ;;  %v392_v10 = vld [vmem:[%s943_s2 + $0x78] sm:$0xff]  ;;  %v391_v11 = vld [vmem:[%s943_s2 + $0x70] sm:$0xff] }
   0xc   : > { %311 = vmatpush.msra.mxu0 %v244_v0  ;;  %s637_s23 = sshll.u32 %s948_s22, 3  ;;  %395 = vmatpush.msra.mxu1 %v392_v10  ;;  %v390_v12 = vld [vmem:[%s943_s2 + $0x68] sm:$0xff]  ;;  %v389_v14 = vld [vmem:[%s943_s2 + $0x60] sm:$0xff]  ;;  %v388_v15 = vld [vmem:[%s943_s2 + $0x58] sm:$0xff] }
   0xd   : > { %s758_s26 = scalar_lea.vmem %s941_s0, %s637_s23  ;;  %658 = vmatpush.msra.mxu3 %v392_v10  ;;  %v387_v16 = vld [vmem:[%s943_s2 + $0x50] sm:$0xff]  ;;  %v386_v17 = vld [vmem:[%s943_s2 + $0x48] sm:$0xff]  ;;  %v385_v19 = vld [vmem:[%s943_s2 + $0x40] sm:$0xff]  ;;  %s920_s9 = scalar_lea.vmem %s946_s5, %s637_s23 }
   0xe   : > { %v228_v1 = vld [vmem:[%s758_s26] sm:$0xff]  ;;  %v229_v2 = vld [vmem:[%s758_s26 + $0x8] sm:$0xff]  ;;  %v230_v3 = vld [vmem:[%s758_s26 + $0x10] sm:$0xff]  ;;  %396 = vmatpush.msra.mxu1 %v391_v11 }
   0xf   : > { %640 = vmatmul.msk.f32.vlgmr.msra.gmra.mxu0 %vm247_vm0, %v228_v1  ;;  %v231_v4 = vld [vmem:[%s758_s26 + $0x18] sm:$0xff]  ;;  %v232_v5 = vld [vmem:[%s758_s26 + $0x20] sm:$0xff]  ;;  %v233_v6 = vld [vmem:[%s758_s26 + $0x28] sm:$0xff]  ;;  %659 = vmatpush.msra.mxu3 %v391_v11 }
  0x10   : > { %v234_v7 = vld [vmem:[%s758_s26 + $0x30] sm:$0xff]  ;;  %v235_v8 = vld [vmem:[%s758_s26 + $0x38] sm:$0xff]  ;;  %v236_v9 = vld [vmem:[%s758_s26 + $0x40] sm:$0xff]  ;;  %397 = vmatpush.msra.mxu1 %v390_v12 }
  0x11   : > { %v237_v13 = vld [vmem:[%s758_s26 + $0x48] sm:$0xff]  ;;  %660 = vmatpush.msra.mxu3 %v390_v12  ;;  %v238_v18 = vld [vmem:[%s758_s26 + $0x50] sm:$0xff]  ;;  %v384_v20 = vld [vmem:[%s943_s2 + $0x38] sm:$0xff] }
  0x12   : > { %398 = vmatpush.msra.mxu1 %v389_v14  ;;  %v383_v21 = vld [vmem:[%s943_s2 + $0x30] sm:$0xff]  ;;  %v382_v22 = vld [vmem:[%s943_s2 + $0x28] sm:$0xff]  ;;  %v239_v23 = vld [vmem:[%s758_s26 + $0x58] sm:$0xff] }
  0x13   : > { %661 = vmatpush.msra.mxu3 %v389_v14  ;;  %v381_v24 = vld [vmem:[%s943_s2 + $0x20] sm:$0xff]  ;;  %v380_v25 = vld [vmem:[%s943_s2 + $0x18] sm:$0xff]  ;;  %v379_v26 = vld [vmem:[%s943_s2 + $0x10] sm:$0xff] }
  0x14   : > { %399 = vmatpush.msra.mxu1 %v388_v15  ;;  %v240_v27 = vld [vmem:[%s758_s26 + $0x60] sm:$0xff]  ;;  %v378_v28 = vld [vmem:[%s943_s2 + $0x8] sm:$0xff]  ;;  %v242_v31 = vld [vmem:[%s758_s26 + $0x70] sm:$0xff] }
  0x15   : > { %662 = vmatpush.msra.mxu3 %v388_v15  ;;  %v377_v29 = vld [vmem:[%s943_s2] sm:$0xff]  ;;  %v241_v30 = vld [vmem:[%s758_s26 + $0x68] sm:$0xff]  ;;  %v243_v32 = vld [vmem:[%s758_s26 + $0x78] sm:$0xff] }
  0x16   : > { %400 = vmatpush.msra.mxu1 %v387_v16  ;;  %v843_v33 = vld [vmem:[%s945_s4] ss:$0 sm:$0xff]  ;;  %v491_v61 = vld [vmem:[%s944_s3 + $0x78] sm:$0xff]  ;;  %v490_v0 = vld [vmem:[%s944_s3 + $0x70] sm:$0xff] }
  0x17   : > { %641 = vmatmul.msk.f32.gmra.mxu0 %vm247_vm0, %v229_v2  ;;  %663 = vmatpush.msra.mxu3 %v387_v16  ;;  %v489_v2 = vld [vmem:[%s944_s3 + $0x68] sm:$0xff]  ;;  %v484_v10 = vld [vmem:[%s944_s3 + $0x40] sm:$0xff]  ;;  %v483_v11 = vld [vmem:[%s944_s3 + $0x38] sm:$0xff] }
  0x18   : > { %401 = vmatpush.msra.mxu1 %v386_v17  ;;  %494 = vmatpush.msra.mxu2 %v491_v61  ;;  %v482_v14 = vld [vmem:[%s944_s3 + $0x30] sm:$0xff]  ;;  %v481_v16 = vld [vmem:[%s944_s3 + $0x28] sm:$0xff] }
  0x19   : > { %664 = vmatpush.msra.mxu3 %v386_v17  ;;  %v480_v17 = vld [vmem:[%s944_s3 + $0x20] sm:$0xff] }
  0x1a   : > { %402 = vmatpush.msra.mxu1 %v385_v19  ;;  %495 = vmatpush.msra.mxu2 %v490_v0 }
  0x1b   : > { %665 = vmatpush.msra.mxu3 %v385_v19 }
  0x1c   : > { %403 = vmatpush.msra.mxu1 %v384_v20  ;;  %496 = vmatpush.msra.mxu2 %v489_v2 }
  0x1d   : > { %666 = vmatpush.msra.mxu3 %v384_v20 }
  0x1e   : > { %404 = vmatpush.msra.mxu1 %v383_v21 }
  0x1f   : > { %642 = vmatmul.msk.f32.gmra.mxu0 %vm247_vm0, %v230_v3  ;;  %667 = vmatpush.msra.mxu3 %v383_v21  ;;  %v488_v3 = vld [vmem:[%s944_s3 + $0x60] sm:$0xff]  ;;  %v478_v21 = vld [vmem:[%s944_s3 + $0x10] sm:$0xff] }
  0x20   : > { %405 = vmatpush.msra.mxu1 %v382_v22  ;;  %497 = vmatpush.msra.mxu2 %v488_v3 }
  0x21   : > { %668 = vmatpush.msra.mxu3 %v382_v22 }
  0x22   : > { %406 = vmatpush.msra.mxu1 %v381_v24 }
  0x23   : > { %669 = vmatpush.msra.mxu3 %v381_v24  ;;  %v476_v24 = vld [vmem:[%s944_s3] sm:$0xff] }
  0x24   : > { %407 = vmatpush.msra.mxu1 %v380_v25 }
  0x25   : > { %670 = vmatpush.msra.mxu3 %v380_v25 }
  0x26   : > { %408 = vmatpush.msra.mxu1 %v379_v26 }
  0x27   : > { %643 = vmatmul.msk.f32.gmra.mxu0 %vm247_vm0, %v231_v4  ;;  %671 = vmatpush.msra.mxu3 %v379_v26  ;;  %v487_v4 = vld [vmem:[%s944_s3 + $0x58] sm:$0xff] }
  0x28   : > { %409 = vmatpush.msra.mxu1 %v378_v28  ;;  %498 = vmatpush.msra.mxu2 %v487_v4 }
  0x29   : > { %672 = vmatpush.msra.mxu3 %v378_v28 }
  0x2a   : > { %410 = vmatpush.msra.mxu1 %v377_v29 }
  0x2b   : > { %673 = vmatpush.msra.mxu3 %v377_v29 }
  0x2d   : > { %674 = vmatpush.msrb.mxu3 %v491_v61 }
  0x2f   : > { %644 = vmatmul.msk.f32.gmra.mxu0 %vm247_vm0, %v232_v5  ;;  %675 = vmatpush.msrb.mxu3 %v490_v0 }
  0x31   : > { %676 = vmatpush.msrb.mxu3 %v489_v2 }
  0x33   : > { %677 = vmatpush.msrb.mxu3 %v488_v3 }
  0x35   : > { %678 = vmatpush.msrb.mxu3 %v487_v4 }
  0x37   : > { %645 = vmatmul.msk.f32.gmra.mxu0 %vm247_vm0, %v233_v6 }
  0x3f   : > { %646 = vmatmul.msk.f32.gmra.mxu0 %vm247_vm0, %v234_v7  ;;  %v486_v7 = vld [vmem:[%s944_s3 + $0x50] sm:$0xff] }
  0x40   : > { %499 = vmatpush.msra.mxu2 %v486_v7  ;;  %679 = vmatpush.msrb.mxu3 %v486_v7 }
  0x47   : > { %647 = vmatmul.msk.f32.gmra.mxu0 %vm247_vm0, %v235_v8 }
  0x4f   : > { %648 = vmatmul.msk.f32.gmra.mxu0 %vm247_vm0, %v236_v9  ;;  %v485_v9 = vld [vmem:[%s944_s3 + $0x48] sm:$0xff] }
  0x50   : > { %500 = vmatpush.msra.mxu2 %v485_v9  ;;  %680 = vmatpush.msrb.mxu3 %v485_v9 }
  0x52   : > { %501 = vmatpush.msra.mxu2 %v484_v10  ;;  %681 = vmatpush.msrb.mxu3 %v484_v10 }
  0x54   : > { %502 = vmatpush.msra.mxu2 %v483_v11  ;;  %682 = vmatpush.msrb.mxu3 %v483_v11 }
  0x56   : > { %503 = vmatpush.msra.mxu2 %v482_v14  ;;  %683 = vmatpush.msrb.mxu3 %v482_v14 }
  0x57   : > { %649 = vmatmul.msk.f32.gmra.mxu0 %vm247_vm0, %v237_v13 }
  0x58   : > { %504 = vmatpush.msra.mxu2 %v481_v16  ;;  %684 = vmatpush.msrb.mxu3 %v481_v16 }
  0x5a   : > { %505 = vmatpush.msra.mxu2 %v480_v17  ;;  %685 = vmatpush.msrb.mxu3 %v480_v17 }
  0x5f   : > { %650 = vmatmul.msk.f32.gmra.mxu0 %vm247_vm0, %v238_v18  ;;  %v479_v18 = vld [vmem:[%s944_s3 + $0x18] sm:$0xff] }
  0x60   : > { %506 = vmatpush.msra.mxu2 %v479_v18  ;;  %686 = vmatpush.msrb.mxu3 %v479_v18 }
  0x62   : > { %507 = vmatpush.msra.mxu2 %v478_v21  ;;  %687 = vmatpush.msrb.mxu3 %v478_v21 }
  0x67   : > { %651 = vmatmul.msk.f32.gmra.mxu0 %vm247_vm0, %v239_v23  ;;  %v477_v23 = vld [vmem:[%s944_s3 + $0x8] sm:$0xff] }
  0x68   : > { %508 = vmatpush.msra.mxu2 %v477_v23  ;;  %688 = vmatpush.msrb.mxu3 %v477_v23 }
  0x6a   : > { %509 = vmatpush.msra.mxu2 %v476_v24  ;;  %689 = vmatpush.msrb.mxu3 %v476_v24 }
  0x6f   : > { %652 = vmatmul.msk.f32.gmra.mxu0 %vm247_vm0, %v240_v27 }
  0x77   : > { %653 = vmatmul.msk.f32.gmra.mxu0 %vm247_vm0, %v241_v30 }
  0x7f   : > { %654 = vmatmul.msk.f32.gmra.mxu0 %vm247_vm0, %v242_v31 }
  0x87   : > { %655 = vmatmul.msk.f32.gmra.mxu0 %vm247_vm0, %v243_v32 }
  0x8c   : > { %v313_v34 = vpop.f32.mrf.mxu0 }
  0x8d   : > { %v314_v35 = vadd.f32 %v843_v33, %v313_v34 }
  0x8f   : > { %v361_v36 = vmax.f32 %v314_v35, 0.0  ;;  %v699_v35 = vld [vmem:[%s945_s4 + $0x1] ss:$0 sm:$0xff] }
  0x91   : > { %411 = vmatmul.f32.vlgmr.msra.gmra.mxu1 %v361_v36 }
  0x94   : > { %v316_v37 = vpop.f32.mrf.mxu0 }
  0x95   : > { %v317_v38 = vadd.f32 %v843_v33, %v316_v37 }
  0x97   : > { %v362_v39 = vmax.f32 %v317_v38, 0.0 }
  0x99   : > { %414 = vmatmul.f32.gmra.mxu1 %v362_v39 }
  0x9c   : > { %v319_v40 = vpop.f32.mrf.mxu0 }
  0x9d   : > { %v320_v41 = vadd.f32 %v843_v33, %v319_v40 }
  0x9f   : > { %v363_v42 = vmax.f32 %v320_v41, 0.0 }
  0xa1   : > { %417 = vmatmul.f32.gmra.mxu1 %v363_v42 }
  0xa4   : > { %v322_v43 = vpop.f32.mrf.mxu0 }
  0xa5   : > { %v323_v44 = vadd.f32 %v843_v33, %v322_v43 }
  0xa7   : > { %v364_v45 = vmax.f32 %v323_v44, 0.0 }
  0xa9   : > { %420 = vmatmul.f32.gmra.mxu1 %v364_v45 }
  0xac   : > { %v325_v46 = vpop.f32.mrf.mxu0 }
  0xad   : > { %v326_v47 = vadd.f32 %v843_v33, %v325_v46 }
  0xaf   : > { %v365_v48 = vmax.f32 %v326_v47, 0.0 }
  0xb1   : > { %423 = vmatmul.f32.gmra.mxu1 %v365_v48 }
  0xb4   : > { %v328_v49 = vpop.f32.mrf.mxu0 }
  0xb5   : > { %v329_v50 = vadd.f32 %v843_v33, %v328_v49 }
  0xb7   : > { %v366_v51 = vmax.f32 %v329_v50, 0.0 }
  0xb9   : > { %426 = vmatmul.f32.gmra.mxu1 %v366_v51 }
  0xbc   : > { %v331_v52 = vpop.f32.mrf.mxu0 }
  0xbd   : > { %v332_v53 = vadd.f32 %v843_v33, %v331_v52 }
  0xbf   : > { %v367_v54 = vmax.f32 %v332_v53, 0.0 }
  0xc1   : > { %429 = vmatmul.f32.gmra.mxu1 %v367_v54 }
  0xc4   : > { %v334_v55 = vpop.f32.mrf.mxu0 }
  0xc5   : > { %v335_v56 = vadd.f32 %v843_v33, %v334_v55 }
  0xc7   : > { %v368_v57 = vmax.f32 %v335_v56, 0.0 }
  0xc9   : > { %432 = vmatmul.f32.gmra.mxu1 %v368_v57 }
  0xcc   : > { %v337_v58 = vpop.f32.mrf.mxu0 }
  0xcd   : > { %v338_v59 = vadd.f32 %v843_v33, %v337_v58 }
  0xcf   : > { %v369_v60 = vmax.f32 %v338_v59, 0.0 }
  0xd1   : > { %435 = vmatmul.f32.gmra.mxu1 %v369_v60 }
  0xd4   : > { %v340_v62 = vpop.f32.mrf.mxu0 }
  0xd5   : > { %v341_v63 = vadd.f32 %v843_v33, %v340_v62 }
  0xd7   : > { %v370_v1 = vmax.f32 %v341_v63, 0.0 }
  0xd9   : > { %438 = vmatmul.f32.gmra.mxu1 %v370_v1 }
  0xdc   : > { %v343_v5 = vpop.f32.mrf.mxu0 }
  0xdd   : > { %v344_v6 = vadd.f32 %v843_v33, %v343_v5 }
  0xdf   : > { %v371_v8 = vmax.f32 %v344_v6, 0.0 }
  0xe1   : > { %441 = vmatmul.f32.gmra.mxu1 %v371_v8 }
  0xe4   : > { %v346_v12 = vpop.f32.mrf.mxu0 }
  0xe5   : > { %v347_v13 = vadd.f32 %v843_v33, %v346_v12 }
  0xe7   : > { %v372_v15 = vmax.f32 %v347_v13, 0.0 }
  0xe9   : > { %444 = vmatmul.f32.vlgmr.msra.gmra.mxu3 %v372_v15 }
  0xec   : > { %v349_v19 = vpop.f32.mrf.mxu0 }
  0xed   : > { %v350_v20 = vadd.f32 %v843_v33, %v349_v19  ;;  %v700_v19 = vld [vmem:[%s945_s4 + $0x2] ss:$0 sm:$0xff] }
  0xef   : > { %v373_v22 = vmax.f32 %v350_v20, 0.0 }
  0xf1   : > { %447 = vmatmul.f32.gmra.mxu3 %v373_v22 }
  0xf4   : > { %v352_v25 = vpop.f32.mrf.mxu0 }
  0xf5   : > { %v353_v26 = vadd.f32 %v843_v33, %v352_v25 }
  0xf7   : > { %v374_v27 = vmax.f32 %v353_v26, 0.0 }
  0xf9   : > { %450 = vmatmul.f32.gmra.mxu3 %v374_v27 }
  0xfc   : > { %v355_v28 = vpop.f32.mrf.mxu0 }
  0xfd   : > { %v356_v29 = vadd.f32 %v843_v33, %v355_v28 }
  0xff   : > { %v375_v30 = vmax.f32 %v356_v29, 0.0 }
 0x101   : > { %453 = vmatmul.f32.gmra.mxu3 %v375_v30 }
 0x104   : > { %v358_v31 = vpop.f32.mrf.mxu0 }
 0x105   : > { %v359_v32 = vadd.f32 %v843_v33, %v358_v31 }
 0x107   : > { %v376_v34 = vmax.f32 %v359_v32, 0.0 }
 0x109   : > { %456 = vmatmul.f32.gmra.mxu3 %v376_v34 }
 0x10e   : > { %v412_v36 = vpop.f32.mrf.mxu1 }
 0x10f   : > { %v413_v37 = vadd.f32 %v699_v35, %v412_v36 }
 0x111   : > { %v460_v38 = vmax.f32 %v413_v37, 0.0 }
 0x113   : > { %510 = vmatmul.f32.vlgmr.msra.gmra.mxu2 %v460_v38 }
 0x116   : > { %v415_v39 = vpop.f32.mrf.mxu1 }
 0x117   : > { %v416_v40 = vadd.f32 %v699_v35, %v415_v39 }
 0x119   : > { %v461_v41 = vmax.f32 %v416_v40, 0.0 }
 0x11b   : > { %513 = vmatmul.f32.gmra.mxu2 %v461_v41 }
 0x11e   : > { %v418_v42 = vpop.f32.mrf.mxu1 }
 0x11f   : > { %v419_v43 = vadd.f32 %v699_v35, %v418_v42 }
 0x121   : > { %v462_v44 = vmax.f32 %v419_v43, 0.0 }
 0x123   : > { %516 = vmatmul.f32.gmra.mxu2 %v462_v44 }
 0x126   : > { %v421_v45 = vpop.f32.mrf.mxu1 }
 0x127   : > { %v422_v33 = vadd.f32 %v699_v35, %v421_v45 }
 0x129   : > { %v463_v46 = vmax.f32 %v422_v33, 0.0 }
 0x12b   : > { %519 = vmatmul.f32.gmra.mxu2 %v463_v46 }
 0x12e   : > { %v424_v47 = vpop.f32.mrf.mxu1 }
 0x12f   : > { %v425_v48 = vadd.f32 %v699_v35, %v424_v47 }
 0x131   : > { %v464_v49 = vmax.f32 %v425_v48, 0.0 }
 0x133   : > { %522 = vmatmul.f32.gmra.mxu2 %v464_v49 }
 0x136   : > { %v427_v50 = vpop.f32.mrf.mxu1 }
 0x137   : > { %v428_v51 = vadd.f32 %v699_v35, %v427_v50 }
 0x139   : > { %v465_v52 = vmax.f32 %v428_v51, 0.0 }
 0x13b   : > { %525 = vmatmul.f32.gmra.mxu2 %v465_v52 }
 0x13e   : > { %v430_v53 = vpop.f32.mrf.mxu1 }
 0x13f   : > { %v431_v54 = vadd.f32 %v699_v35, %v430_v53 }
 0x141   : > { %v466_v55 = vmax.f32 %v431_v54, 0.0 }
 0x143   : > { %528 = vmatmul.f32.gmra.mxu2 %v466_v55 }
 0x146   : > { %v433_v56 = vpop.f32.mrf.mxu1 }
 0x147   : > { %v434_v57 = vadd.f32 %v699_v35, %v433_v56 }
 0x149   : > { %v467_v58 = vmax.f32 %v434_v57, 0.0 }
 0x14b   : > { %531 = vmatmul.f32.gmra.mxu2 %v467_v58 }
 0x14e   : > { %v436_v59 = vpop.f32.mrf.mxu1 }
 0x14f   : > { %v437_v60 = vadd.f32 %v699_v35, %v436_v59 }
 0x151   : > { %v468_v61 = vmax.f32 %v437_v60, 0.0 }
 0x153   : > { %534 = vmatmul.f32.gmra.mxu2 %v468_v61 }
 0x156   : > { %v439_v62 = vpop.f32.mrf.mxu1 }
 0x157   : > { %v440_v63 = vadd.f32 %v699_v35, %v439_v62 }
 0x159   : > { %v469_v0 = vmax.f32 %v440_v63, 0.0 }
 0x15b   : > { %537 = vmatmul.f32.gmra.mxu2 %v469_v0 }
 0x15e   : > { %v442_v1 = vpop.f32.mrf.mxu1 }
 0x15f   : > { %v443_v2 = vadd.f32 %v699_v35, %v442_v1 }
 0x161   : > { %v470_v3 = vmax.f32 %v443_v2, 0.0 }
 0x163   : > { %540 = vmatmul.f32.gmra.mxu2 %v470_v3 }
 0x16c   : > { %v445_v4 = vpop.f32.mrf.mxu3 }
 0x16d   : > { %v446_v5 = vadd.f32 %v699_v35, %v445_v4 }
 0x16f   : > { %v471_v6 = vmax.f32 %v446_v5, 0.0 }
 0x171   : > { %543 = vmatmul.f32.vlgmr.msrb.gmra.mxu3 %v471_v6 }
 0x174   : > { %v448_v7 = vpop.f32.mrf.mxu3 }
 0x175   : > { %v449_v8 = vadd.f32 %v699_v35, %v448_v7 }
 0x177   : > { %v472_v9 = vmax.f32 %v449_v8, 0.0 }
 0x179   : > { %546 = vmatmul.f32.gmra.mxu3 %v472_v9 }
 0x17c   : > { %v451_v10 = vpop.f32.mrf.mxu3 }
 0x17d   : > { %v452_v11 = vadd.f32 %v699_v35, %v451_v10 }
 0x17f   : > { %v473_v12 = vmax.f32 %v452_v11, 0.0 }
 0x181   : > { %549 = vmatmul.f32.gmra.mxu3 %v473_v12 }
 0x184   : > { %v454_v13 = vpop.f32.mrf.mxu3 }
 0x185   : > { %v455_v14 = vadd.f32 %v699_v35, %v454_v13 }
 0x187   : > { %v474_v15 = vmax.f32 %v455_v14, 0.0 }
 0x189   : > { %552 = vmatmul.f32.gmra.mxu3 %v474_v15 }
 0x18c   : > { %v457_v16 = vpop.f32.mrf.mxu3 }
 0x18d   : > { %v458_v17 = vadd.f32 %v699_v35, %v457_v16 }
 0x18f   : > { %v475_v18 = vmax.f32 %v458_v17, 0.0 }
 0x191   : > { %555 = vmatmul.f32.gmra.mxu3 %v475_v18 }
 0x196   : > { %v511_v20 = vpop.f32.mrf.mxu2 }
 0x197   : > { %v512_v21 = vadd.f32 %v700_v19, %v511_v20 }
 0x199   : > { %559 = vst [vmem:[%s920_s9] sm:$0xff] %v512_v21 }
 0x19e   : > { %v514_v22 = vpop.f32.mrf.mxu2 }
 0x19f   : > { %v515_v23 = vadd.f32 %v700_v19, %v514_v22 }
 0x1a1   : > { %560 = vst [vmem:[%s920_s9 + $0x8] sm:$0xff] %v515_v23 }
 0x1a6   : > { %v517_v24 = vpop.f32.mrf.mxu2 }
 0x1a7   : > { %v518_v25 = vadd.f32 %v700_v19, %v517_v24 }
 0x1a9   : > { %561 = vst [vmem:[%s920_s9 + $0x10] sm:$0xff] %v518_v25 }
 0x1ae   : > { %v520_v26 = vpop.f32.mrf.mxu2 }
 0x1af   : > { %v521_v27 = vadd.f32 %v700_v19, %v520_v26 }
 0x1b1   : > { %562 = vst [vmem:[%s920_s9 + $0x18] sm:$0xff] %v521_v27 }
 0x1b6   : > { %v523_v28 = vpop.f32.mrf.mxu2 }
 0x1b7   : > { %v524_v29 = vadd.f32 %v700_v19, %v523_v28 }
 0x1b9   : > { %563 = vst [vmem:[%s920_s9 + $0x20] sm:$0xff] %v524_v29 }
 0x1be   : > { %v526_v30 = vpop.f32.mrf.mxu2 }
 0x1bf   : > { %v527_v31 = vadd.f32 %v700_v19, %v526_v30 }
 0x1c1   : > { %564 = vst [vmem:[%s920_s9 + $0x28] sm:$0xff] %v527_v31 }
 0x1c6   : > { %v529_v32 = vpop.f32.mrf.mxu2 }
 0x1c7   : > { %v530_v34 = vadd.f32 %v700_v19, %v529_v32 }
 0x1c9   : > { %565 = vst [vmem:[%s920_s9 + $0x30] sm:$0xff] %v530_v34 }
 0x1ce   : > { %v532_v35 = vpop.f32.mrf.mxu2 }
 0x1cf   : > { %v533_v36 = vadd.f32 %v700_v19, %v532_v35 }
 0x1d1   : > { %566 = vst [vmem:[%s920_s9 + $0x38] sm:$0xff] %v533_v36 }
 0x1d6   : > { %v535_v37 = vpop.f32.mrf.mxu2 }
 0x1d7   : > { %v536_v38 = vadd.f32 %v700_v19, %v535_v37 }
 0x1d9   : > { %567 = vst [vmem:[%s920_s9 + $0x40] sm:$0xff] %v536_v38 }
 0x1de   : > { %v538_v39 = vpop.f32.mrf.mxu2 }
 0x1df   : > { %v539_v40 = vadd.f32 %v700_v19, %v538_v39 }
 0x1e1   : > { %568 = vst [vmem:[%s920_s9 + $0x48] sm:$0xff] %v539_v40 }
 0x1e6   : > { %v541_v41 = vpop.f32.mrf.mxu2 }
 0x1e7   : > { %v542_v42 = vadd.f32 %v700_v19, %v541_v41 }
 0x1e9   : > { %569 = vst [vmem:[%s920_s9 + $0x50] sm:$0xff] %v542_v42 }
 0x1f4   : > { %v544_v43 = vpop.f32.mrf.mxu3 }
 0x1f5   : > { %v545_v44 = vadd.f32 %v700_v19, %v544_v43 }
 0x1f7   : > { %570 = vst [vmem:[%s920_s9 + $0x58] sm:$0xff] %v545_v44 }
 0x1fc   : > { %v547_v45 = vpop.f32.mrf.mxu3 }
 0x1fd   : > { %v548_v33 = vadd.f32 %v700_v19, %v547_v45 }
 0x1ff   : > { %571 = vst [vmem:[%s920_s9 + $0x60] sm:$0xff] %v548_v33 }
 0x204   : > { %v550_v46 = vpop.f32.mrf.mxu3 }
 0x205   : > { %v551_v47 = vadd.f32 %v700_v19, %v550_v46 }
 0x207   : > { %572 = vst [vmem:[%s920_s9 + $0x68] sm:$0xff] %v551_v47 }
 0x20c   : > { %v553_v48 = vpop.f32.mrf.mxu3 }
 0x20d   : > { %v554_v49 = vadd.f32 %v700_v19, %v553_v48 }
 0x20f   : > { %573 = vst [vmem:[%s920_s9 + $0x70] sm:$0xff] %v554_v49 }
 0x214   : > { %v556_v50 = vpop.f32.mrf.mxu3 }
 0x215   : > { %v557_v51 = vadd.f32 %v700_v19, %v556_v50 }
 0x217   : > { %574 = vst [vmem:[%s920_s9 + $0x78] sm:$0xff] %v557_v51 }
 0x218 PF: > { %s15_s18 = sadd.s32 1, %s707_s18  }
 0x219   : > { %p12_p4 = scmp.ge.s32.totalorder %s15_s18, 4  }
 0x21b   :  { %14 = sbr.rel (!%p12_p4) target bundleno = 1 (0x1), region = 70 }

</bundles_post_ra>
